<compile_context>
chip_gen: v7x
topology: tpu7x:2x2x1
jax: 0.10.0
libtpu: 0.0.40
codegen_flags: <defaults>
</compile_context>

<pallas_src>
import jax
import jax.numpy as jnp
from jax import lax
from jax.experimental import pallas as pl
from jax.experimental.pallas import tpu as pltpu


# --------------------------------------------------------------------------- #
# Kernels
# --------------------------------------------------------------------------- #
def _upsample_conv_kernel(xb_ref, w_ref, b_ref, out_ref, x9_ref):
    """Fused 2x nearest upsample + 3x3 conv (pad=1) for one (batch, rows, Cout) tile.

    xb_ref : (1, 1, TH+2, W+2, Cin)  haloed low-res NHWC tile (zero border rows/cols)
    w_ref  : (9*Cin, 4*TCout)        folded weights; rows=(tap, Cin), cols=(Cout, a, b)
    b_ref  : (1, 4*TCout)            bias replicated over the 4 sub-pixels
    out_ref: (1, TH*W, 4*TCout)      all four output sub-pixels of the conv
    x9_ref : (TH*W, 9*Cin)           VMEM scratch: shared im2col block
    """
    _, _, thp2, wp2, cin = xb_ref.shape
    th, w = thp2 - 2, wp2 - 2
    # Build the 9 shifted low-res views ONCE (shared by all 4 sub-pixels); the
    # 2x-upsample / sub-pixel bookkeeping lives entirely in the folded weights.
    for dr in range(3):
        for dc in range(3):
            k = dr * 3 + dc
            tap = xb_ref[0, 0, dr:dr + th, dc:dc + w, :]          # (TH, W, Cin)
            x9_ref[:, k * cin:(k + 1) * cin] = tap.reshape(th * w, cin)
    # One MXU matmul per tile: K = 9*Cin, N = 4*TCout (lane-dense for real nets).
    y = jnp.dot(x9_ref[...], w_ref[...], preferred_element_type=jnp.float32)
    out_ref[0] = (y + b_ref[...]).astype(out_ref.dtype)


def _upsample_nn_kernel(x_ref, d_ref, out_ref):
    """Pure deterministic 2x nearest upsample, written NCHW-direct.

    x_ref  : (1, TC, TH, W)       NCHW input tile
    d_ref  : (W, 2W)              constant 0/1 width-duplication matrix
    out_ref: (1, TC, TH, 2, 2W)   rows (h, a); wrapper merge to (.., 2H, 2W) is free
    """
    _, tc, th, w = x_ref.shape
    xv = x_ref[0].reshape(tc * th, w)
    y = jnp.dot(xv, d_ref[...], preferred_element_type=jnp.float32)   # width 2x
    y = y.reshape(tc, th, 2 * w).astype(out_ref.dtype)
    out_ref[0, :, :, 0, :] = y        # output row 2h
    out_ref[0, :, :, 1, :] = y        # output row 2h+1


# --------------------------------------------------------------------------- #
# Tile choosers
# --------------------------------------------------------------------------- #
def _pick_row_tile(h, w, target_rows=512):
    """Divisor row tile whose flattened (rows*W) block obeys the (8,128) rule."""
    best = h
    for th in range(1, h + 1):
        if h % th:
            continue
        if (th * w) % 8 != 0 and th != h:
            continue
        if abs(th * w - target_rows) < abs(best * w - target_rows):
            best = th
    return best


def _pick_cout_tile(cout, target_lanes=512):
    best = cout
    for tc in range(1, cout + 1):
        if cout % tc:
            continue
        if (4 * tc) % 128 != 0 and tc != cout:
            continue
        if abs(4 * tc - target_lanes) < abs(4 * best - target_lanes):
            best = tc
    return best


# --------------------------------------------------------------------------- #
# Wrappers
# --------------------------------------------------------------------------- #
def _upsample_nn(x, row_tile=None, chan_tile=None):
    """use_conv=False path: gridded Pallas kernel that writes NCHW directly."""
    n, c, h, w = x.shape
    th = row_tile if row_tile is not None else next(
        (t for t in (64, 32, 16, 8) if h % t == 0), h)
    assert h % th == 0 and (th % 8 == 0 or th == h)
    tc = chan_tile if chan_tile is not None else (
        c if c <= 256 else next((t for t in (256, 128, 64, 32) if c % t == 0), c))
    assert c % tc == 0

    # Constant 0/1 duplication matrix: exact on the MXU, keeps the width
    # interleave on-chip so the output is written NCHW-direct (no transpose).
    dup = (jnp.arange(w)[:, None] == (jnp.arange(2 * w)[None, :] // 2)
           ).astype(jnp.float32)

    out = pl.pallas_call(
        _upsample_nn_kernel,
        out_shape=jax.ShapeDtypeStruct((n, c, h, 2, 2 * w), x.dtype),
        grid_spec=pltpu.PrefetchScalarGridSpec(
            num_scalar_prefetch=0,
            grid=(n, c // tc, h // th),
            in_specs=[
                pl.BlockSpec((1, tc, th, w), lambda b, cb, j: (b, cb, j, 0)),
                pl.BlockSpec((w, 2 * w), lambda b, cb, j: (0, 0)),
            ],
            out_specs=pl.BlockSpec((1, tc, th, 2, 2 * w),
                                   lambda b, cb, j: (b, cb, j, 0, 0)),
        ),
        compiler_params=pltpu.CompilerParams(
            dimension_semantics=("parallel", "parallel", "parallel")),
    )(x.astype(jnp.float32), dup)
    # (N, C, H, 2, 2W) -> (N, C, 2H, 2W): adjacent-dim merge, free (no HBM pass).
    return out.reshape(n, c, 2 * h, 2 * w).astype(x.dtype)


def upsample_forward(x, params=None, use_conv=True, row_tile=None, cout_tile=None):
    """Pallas equivalent of Upsample.forward (dims=2). x: (N, C, H, W) NCHW."""
    if not use_conv:
        return _upsample_nn(x, row_tile=row_tile)

    n, cin, h, w = x.shape
    wgt, bias = params["w"], params["b"]            # (Cout, Cin, 3, 3), (Cout,)
    cout = wgt.shape[0]

    th = row_tile if row_tile is not None else _pick_row_tile(h, w)
    assert h % th == 0 and ((th * w) % 8 == 0 or th == h), (th, h, w)
    tcout = cout_tile if cout_tile is not None else _pick_cout_tile(cout)
    assert cout % tcout == 0 and ((4 * tcout) % 128 == 0 or tcout == cout)
    nblk = h // th

    # ---- folded weights: 2x nearest upsample absorbed into the 3x3 taps ------
    # out[n,o,2h+a,2w+b] = bias[o] + sum_{ci,dr,dc} WF[dr,dc,ci,o,a,b] *
    #                      xpad[n, h+dr, w+dc, ci],
    # where WF sums the original taps (kr,kc) that collapse onto low-res offset
    # (dr,dc) for sub-pixel (a,b):  dr = floor((a+kr-1)/2), dc = floor((b+kc-1)/2).
    wt = wgt.astype(jnp.float32)                                     # (Co,Ci,3,3)
    a_ = jnp.arange(2)[:, None, None]
    k_ = jnp.arange(3)[None, :, None]
    r_ = jnp.arange(3)[None, None, :]
    fold = ((a_ + k_ - 1) // 2 == (r_ - 1)).astype(jnp.float32)      # (2, 3, 3)
    wf = jnp.einsum('akr,bls,oikl->rsioab', fold, fold, wt)          # (3,3,Ci,Co,2,2)
    wmat = wf.reshape(9 * cin, 4 * cout)            # rows=(tap,ci), cols=(o,a,b)
    bcol = jnp.repeat(bias.astype(jnp.float32), 4).reshape(1, 4 * cout)

    # ---- input prep: NHWC + 1px zero ring + haloed row blocks (1x-sized data) -
    # TODO(synk): replace this small gather with an element-indexed (halo)
    # BlockSpec once pl.Element halos are battle-tested; it is one XLA pass over
    # the low-res input only -- the 4x output never takes an extra pass any more.
    x_nhwc = jnp.transpose(x.astype(jnp.float32), (0, 2, 3, 1))
    xpad = jnp.pad(x_nhwc, ((0, 0), (1, 1), (1, 1), (0, 0)))
    ridx = jnp.arange(nblk)[:, None] * th + jnp.arange(th + 2)[None, :]
    xblk = xpad[:, ridx]                             # (N, nblk, TH+2, W+2, Cin)

    # ---- compiler params: explicit VMEM budget when tiles outgrow 32 MiB ------
    blk_bytes = 4 * ((th + 2) * (w + 2) * cin + 9 * cin * 4 * tcout + 4 * tcout
                     + th * w * 4 * tcout + th * w * 9 * cin)
    cp = dict(dimension_semantics=("arbitrary", "parallel", "parallel"))
    if 3 * blk_bytes > 32 * 1024 * 1024:
        cp["vmem_limit_bytes"] = min(3 * blk_bytes, 64 * 1024 * 1024)

    out_flat = pl.pallas_call(
        _upsample_conv_kernel,
        out_shape=jax.ShapeDtypeStruct((n, h * w, 4 * cout), jnp.float32),
        grid_spec=pltpu.PrefetchScalarGridSpec(
            num_scalar_prefetch=0,
            grid=(cout // tcout, n, nblk),           # Cout-tiles outermost so the
            in_specs=[                               # weight block stays resident.
                pl.BlockSpec((1, 1, th + 2, w + 2, cin),
                             lambda c, b, j: (b, j, 0, 0, 0)),
                pl.BlockSpec((9 * cin, 4 * tcout), lambda c, b, j: (0, c)),
                pl.BlockSpec((1, 4 * tcout), lambda c, b, j: (0, c)),
            ],
            out_specs=pl.BlockSpec((1, th * w, 4 * tcout),
                                   lambda c, b, j: (b, j, c)),
            scratch_shapes=[pltpu.VMEM((th * w, 9 * cin), jnp.float32)],
        ),
        compiler_params=pltpu.CompilerParams(**cp),
    )(xblk, wmat, bcol)

    # ---- glue: one metadata reshape + ONE XLA transpose to NCHW ---------------
    y = out_flat.reshape(n, h, w, cout, 2, 2)
    y = jnp.transpose(y, (0, 3, 1, 4, 2, 5)).reshape(n, cout, 2 * h, 2 * w)
    return y.astype(x.dtype)


# --------------------------------------------------------------------------- #
# Pure-JAX reference (matches the PyTorch module semantics)
# --------------------------------------------------------------------------- #
def ref_forward(x, params, use_conv=True):
    xu = jnp.repeat(jnp.repeat(x, 2, axis=2), 2, axis=3)
    if not use_conv:
        return xu
    w, b = params["w"], params["b"]
    y = lax.conv_general_dilated(xu, w, window_strides=(1, 1),
                                 padding=((1, 1), (1, 1)),
                                 dimension_numbers=("NCHW", "OIHW", "NCHW"))
    return y + b[None, :, None, None]


if __name__ == "__main__":
    key = jax.random.PRNGKey(0)
    k1, k2, k3 = jax.random.split(key, 3)

    N, C, H, W = 2, 4, 16, 16
    Cout = C
    x = jax.random.normal(k1, (N, C, H, W), jnp.float32)
    params = {
        "w": jax.random.normal(k2, (Cout, C, 3, 3), jnp.float32) * 0.1,
        "b": jax.random.normal(k3, (Cout,), jnp.float32) * 0.1,
    }

    # use_conv=True: tiled grid (Cout-tiles x batch x row-tiles), 2 row blocks.
    conv_fn = jax.jit(lambda xx: upsample_forward(xx, params, use_conv=True,
                                                  row_tile=8))
    y = jax.block_until_ready(conv_fn(x))
    y_ref = ref_forward(x, params, use_conv=True)
    assert y.shape == (N, Cout, 2 * H, 2 * W)
    assert jnp.allclose(y, y_ref, atol=1e-4, rtol=1e-4), \
        float(jnp.max(jnp.abs(y - y_ref)))

    # Default tile-chooser path (single row block) must agree as well.
    y_auto = jax.block_until_ready(
        jax.jit(lambda xx: upsample_forward(xx, params, use_conv=True))(x))
    assert jnp.allclose(y_auto, y_ref, atol=1e-4, rtol=1e-4)

    # use_conv=False: NCHW-direct nearest-neighbor upsample kernel.
    nn_fn = jax.jit(lambda xx: upsample_forward(xx, None, use_conv=False,
                                                row_tile=8))
    y2 = jax.block_until_ready(nn_fn(x))
    assert y2.shape == (N, C, 2 * H, 2 * W)
    assert jnp.allclose(y2, ref_forward(x, None, use_conv=False),
                        atol=1e-5, rtol=1e-5)

    print("KERNEL_OK")
</pallas_src>

<mosaic_0001>
module attributes {stable_mosaic.version = 11 : i64} {
  func.func @_upsample_conv_kernel(%arg0: i32, %arg1: i32, %arg2: i32, %arg3: memref<1x1x10x18x4xf32, #tpu.memory_space<vmem>>, %arg4: memref<36x16xf32, #tpu.memory_space<vmem>>, %arg5: memref<1x16xf32, #tpu.memory_space<vmem>>, %arg6: memref<1x128x16xf32, #tpu.memory_space<vmem>>, %arg7: memref<128x36xf32, #tpu.memory_space<vmem>>) attributes {dimension_semantics = [#tpu.dimension_semantics<arbitrary>, #tpu.dimension_semantics<parallel>, #tpu.dimension_semantics<parallel>], iteration_bounds = array<i64: 1, 2, 2>, scalar_prefetch = 0 : i64, scratch_operands = 1 : i64, tpu.core_type = #tpu.core_type<tc>, window_params = [{transform_indices = @transform_0, window_bounds = array<i64: 1, 1, 10, 18, 4>}, {transform_indices = @transform_1, window_bounds = array<i64: 36, 16>}, {transform_indices = @transform_2, window_bounds = array<i64: 1, 16>}, {transform_indices = @transform_3, window_bounds = array<i64: 1, 128, 16>}]} {
    %c0 = arith.constant 0 : index
    %c0_0 = arith.constant 0 : index
    %c0_1 = arith.constant 0 : index
    %c0_2 = arith.constant 0 : index
    %c0_3 = arith.constant 0 : index
    %0 = vector.load %arg3[%c0, %c0_0, %c0_1, %c0_2, %c0_3] : memref<1x1x10x18x4xf32, #tpu.memory_space<vmem>>, vector<1x1x8x16x4xf32>
    %1 = vector.shape_cast %0 : vector<1x1x8x16x4xf32> to vector<8x16x4xf32>
    %2 = vector.shape_cast %1 : vector<8x16x4xf32> to vector<128x4xf32>
    %c0_4 = arith.constant 0 : index
    %c0_5 = arith.constant 0 : index
    %3 = vector.load %arg7[%c0_4, %c0_5] : memref<128x36xf32, #tpu.memory_space<vmem>>, vector<128x4xf32>
    tpu.vector_store %arg7[%c0_4, %c0_5], %2 {strides = array<i32>} : memref<128x36xf32, #tpu.memory_space<vmem>>, vector<128x4xf32>,
    %c0_6 = arith.constant 0 : index
    %c0_7 = arith.constant 0 : index
    %c0_8 = arith.constant 0 : index
    %c1 = arith.constant 1 : index
    %c0_9 = arith.constant 0 : index
    %4 = vector.load %arg3[%c0_6, %c0_7, %c0_8, %c1, %c0_9] : memref<1x1x10x18x4xf32, #tpu.memory_space<vmem>>, vector<1x1x8x16x4xf32>
    %5 = vector.shape_cast %4 : vector<1x1x8x16x4xf32> to vector<8x16x4xf32>
    %6 = vector.shape_cast %5 : vector<8x16x4xf32> to vector<128x4xf32>
    %c0_10 = arith.constant 0 : index
    %c4 = arith.constant 4 : index
    %7 = vector.load %arg7[%c0_10, %c4] : memref<128x36xf32, #tpu.memory_space<vmem>>, vector<128x4xf32>
    tpu.vector_store %arg7[%c0_10, %c4], %6 {strides = array<i32>} : memref<128x36xf32, #tpu.memory_space<vmem>>, vector<128x4xf32>,
    %c0_11 = arith.constant 0 : index
    %c0_12 = arith.constant 0 : index
    %c0_13 = arith.constant 0 : index
    %c2 = arith.constant 2 : index
    %c0_14 = arith.constant 0 : index
    %8 = vector.load %arg3[%c0_11, %c0_12, %c0_13, %c2, %c0_14] : memref<1x1x10x18x4xf32, #tpu.memory_space<vmem>>, vector<1x1x8x16x4xf32>
    %9 = vector.shape_cast %8 : vector<1x1x8x16x4xf32> to vector<8x16x4xf32>
    %10 = vector.shape_cast %9 : vector<8x16x4xf32> to vector<128x4xf32>
    %c0_15 = arith.constant 0 : index
    %c8 = arith.constant 8 : index
    %11 = vector.load %arg7[%c0_15, %c8] : memref<128x36xf32, #tpu.memory_space<vmem>>, vector<128x4xf32>
    tpu.vector_store %arg7[%c0_15, %c8], %10 {strides = array<i32>} : memref<128x36xf32, #tpu.memory_space<vmem>>, vector<128x4xf32>,
    %c0_16 = arith.constant 0 : index
    %c0_17 = arith.constant 0 : index
    %c1_18 = arith.constant 1 : index
    %c0_19 = arith.constant 0 : index
    %c0_20 = arith.constant 0 : index
    %12 = vector.load %arg3[%c0_16, %c0_17, %c1_18, %c0_19, %c0_20] : memref<1x1x10x18x4xf32, #tpu.memory_space<vmem>>, vector<1x1x8x16x4xf32>
    %13 = vector.shape_cast %12 : vector<1x1x8x16x4xf32> to vector<8x16x4xf32>
    %14 = vector.shape_cast %13 : vector<8x16x4xf32> to vector<128x4xf32>
    %c0_21 = arith.constant 0 : index
    %c12 = arith.constant 12 : index
    %15 = vector.load %arg7[%c0_21, %c12] : memref<128x36xf32, #tpu.memory_space<vmem>>, vector<128x4xf32>
    tpu.vector_store %arg7[%c0_21, %c12], %14 {strides = array<i32>} : memref<128x36xf32, #tpu.memory_space<vmem>>, vector<128x4xf32>,
    %c0_22 = arith.constant 0 : index
    %c0_23 = arith.constant 0 : index
    %c1_24 = arith.constant 1 : index
    %c1_25 = arith.constant 1 : index
    %c0_26 = arith.constant 0 : index
    %16 = vector.load %arg3[%c0_22, %c0_23, %c1_24, %c1_25, %c0_26] : memref<1x1x10x18x4xf32, #tpu.memory_space<vmem>>, vector<1x1x8x16x4xf32>
    %17 = vector.shape_cast %16 : vector<1x1x8x16x4xf32> to vector<8x16x4xf32>
    %18 = vector.shape_cast %17 : vector<8x16x4xf32> to vector<128x4xf32>
    %c0_27 = arith.constant 0 : index
    %c16 = arith.constant 16 : index
    %19 = vector.load %arg7[%c0_27, %c16] : memref<128x36xf32, #tpu.memory_space<vmem>>, vector<128x4xf32>
    tpu.vector_store %arg7[%c0_27, %c16], %18 {strides = array<i32>} : memref<128x36xf32, #tpu.memory_space<vmem>>, vector<128x4xf32>,
    %c0_28 = arith.constant 0 : index
    %c0_29 = arith.constant 0 : index
    %c1_30 = arith.constant 1 : index
    %c2_31 = arith.constant 2 : index
    %c0_32 = arith.constant 0 : index
    %20 = vector.load %arg3[%c0_28, %c0_29, %c1_30, %c2_31, %c0_32] : memref<1x1x10x18x4xf32, #tpu.memory_space<vmem>>, vector<1x1x8x16x4xf32>
    %21 = vector.shape_cast %20 : vector<1x1x8x16x4xf32> to vector<8x16x4xf32>
    %22 = vector.shape_cast %21 : vector<8x16x4xf32> to vector<128x4xf32>
    %c0_33 = arith.constant 0 : index
    %c20 = arith.constant 20 : index
    %23 = vector.load %arg7[%c0_33, %c20] : memref<128x36xf32, #tpu.memory_space<vmem>>, vector<128x4xf32>
    tpu.vector_store %arg7[%c0_33, %c20], %22 {strides = array<i32>} : memref<128x36xf32, #tpu.memory_space<vmem>>, vector<128x4xf32>,
    %c0_34 = arith.constant 0 : index
    %c0_35 = arith.constant 0 : index
    %c2_36 = arith.constant 2 : index
    %c0_37 = arith.constant 0 : index
    %c0_38 = arith.constant 0 : index
    %24 = vector.load %arg3[%c0_34, %c0_35, %c2_36, %c0_37, %c0_38] : memref<1x1x10x18x4xf32, #tpu.memory_space<vmem>>, vector<1x1x8x16x4xf32>
    %25 = vector.shape_cast %24 : vector<1x1x8x16x4xf32> to vector<8x16x4xf32>
    %26 = vector.shape_cast %25 : vector<8x16x4xf32> to vector<128x4xf32>
    %c0_39 = arith.constant 0 : index
    %c24 = arith.constant 24 : index
    %27 = vector.load %arg7[%c0_39, %c24] : memref<128x36xf32, #tpu.memory_space<vmem>>, vector<128x4xf32>
    tpu.vector_store %arg7[%c0_39, %c24], %26 {strides = array<i32>} : memref<128x36xf32, #tpu.memory_space<vmem>>, vector<128x4xf32>,
    %c0_40 = arith.constant 0 : index
    %c0_41 = arith.constant 0 : index
    %c2_42 = arith.constant 2 : index
    %c1_43 = arith.constant 1 : index
    %c0_44 = arith.constant 0 : index
    %28 = vector.load %arg3[%c0_40, %c0_41, %c2_42, %c1_43, %c0_44] : memref<1x1x10x18x4xf32, #tpu.memory_space<vmem>>, vector<1x1x8x16x4xf32>
    %29 = vector.shape_cast %28 : vector<1x1x8x16x4xf32> to vector<8x16x4xf32>
    %30 = vector.shape_cast %29 : vector<8x16x4xf32> to vector<128x4xf32>
    %c0_45 = arith.constant 0 : index
    %c28 = arith.constant 28 : index
    %31 = vector.load %arg7[%c0_45, %c28] : memref<128x36xf32, #tpu.memory_space<vmem>>, vector<128x4xf32>
    tpu.vector_store %arg7[%c0_45, %c28], %30 {strides = array<i32>} : memref<128x36xf32, #tpu.memory_space<vmem>>, vector<128x4xf32>,
    %c0_46 = arith.constant 0 : index
    %c0_47 = arith.constant 0 : index
    %c2_48 = arith.constant 2 : index
    %c2_49 = arith.constant 2 : index
    %c0_50 = arith.constant 0 : index
    %32 = vector.load %arg3[%c0_46, %c0_47, %c2_48, %c2_49, %c0_50] : memref<1x1x10x18x4xf32, #tpu.memory_space<vmem>>, vector<1x1x8x16x4xf32>
    %33 = vector.shape_cast %32 : vector<1x1x8x16x4xf32> to vector<8x16x4xf32>
    %34 = vector.shape_cast %33 : vector<8x16x4xf32> to vector<128x4xf32>
    %c0_51 = arith.constant 0 : index
    %c32 = arith.constant 32 : index
    %35 = vector.load %arg7[%c0_51, %c32] : memref<128x36xf32, #tpu.memory_space<vmem>>, vector<128x4xf32>
    tpu.vector_store %arg7[%c0_51, %c32], %34 {strides = array<i32>} : memref<128x36xf32, #tpu.memory_space<vmem>>, vector<128x4xf32>,
    %c0_52 = arith.constant 0 : index
    %c0_53 = arith.constant 0 : index
    %36 = vector.load %arg7[%c0_52, %c0_53] : memref<128x36xf32, #tpu.memory_space<vmem>>, vector<128x36xf32>
    %c0_54 = arith.constant 0 : index
    %c0_55 = arith.constant 0 : index
    %37 = vector.load %arg4[%c0_54, %c0_55] : memref<36x16xf32, #tpu.memory_space<vmem>>, vector<36x16xf32>
    %cst = arith.constant dense<0.000000e+00> : vector<128x16xf32>
    %38 = tpu.matmul %36, %37, %cst {dimension_numbers = #tpu.dot_dimension_numbers<[1], [0], [0], [1], [0, 0, 1, 1], [], []>} : vector<128x36xf32>, vector<36x16xf32>, vector<128x16xf32> -> vector<128x16xf32>
    %c0_56 = arith.constant 0 : index
    %c0_57 = arith.constant 0 : index
    %39 = vector.load %arg5[%c0_56, %c0_57] : memref<1x16xf32, #tpu.memory_space<vmem>>, vector<1x16xf32>
    %40 = vector.broadcast %39 : vector<1x16xf32> to vector<128x16xf32>
    %41 = arith.addf %38, %40 : vector<128x16xf32>
    %c0_58 = arith.constant 0 : index
    %c0_59 = arith.constant 0 : index
    %c0_60 = arith.constant 0 : index
    %42 = vector.load %arg6[%c0_58, %c0_59, %c0_60] : memref<1x128x16xf32, #tpu.memory_space<vmem>>, vector<1x128x16xf32>
    %43 = vector.shape_cast %42 : vector<1x128x16xf32> to vector<128x16xf32>
    %44 = vector.shape_cast %41 : vector<128x16xf32> to vector<1x128x16xf32>
    tpu.vector_store %arg6[%c0_58, %c0_59, %c0_60], %44 {strides = array<i32>} : memref<1x128x16xf32, #tpu.memory_space<vmem>>, vector<1x128x16xf32>,
    return
  }
  func.func @transform_0(%arg0: i32, %arg1: i32, %arg2: i32) -> (i32, i32, i32, i32, i32) {
    %c0_i32 = arith.constant 0 : i32
    %c0_i32_0 = arith.constant 0 : i32
    %c0_i32_1 = arith.constant 0 : i32
    %c0_i32_2 = arith.constant 0 : i32
    return %arg1, %arg2, %c0_i32, %c0_i32_0, %c0_i32_1 : i32, i32, i32, i32, i32
  }
  func.func @transform_1(%arg0: i32, %arg1: i32, %arg2: i32) -> (i32, i32) {
    %c0_i32 = arith.constant 0 : i32
    %c0_i32_0 = arith.constant 0 : i32
    return %c0_i32, %arg0 : i32, i32
  }
  func.func @transform_2(%arg0: i32, %arg1: i32, %arg2: i32) -> (i32, i32) {
    %c0_i32 = arith.constant 0 : i32
    %c0_i32_0 = arith.constant 0 : i32
    return %c0_i32, %arg0 : i32, i32
  }
  func.func @transform_3(%arg0: i32, %arg1: i32, %arg2: i32) -> (i32, i32, i32) {
    %c0_i32 = arith.constant 0 : i32
    return %arg1, %arg2, %arg0 : i32, i32, i32
  }
}

</mosaic_0001>

<bundles_post_ra>
// kernel: _lambda_.1
= control target key start
LH: loop header
LB: loop body
LE: loop exit
PB: predicated region body
PF: predicated region fallthrough
CT: control target
= control target key end

     0   :  { %s1755_s12 = smov 0   ;;  %s1757_s13 = smov 0   ;;  %s2317_s0 = inlined_call_operand.vmem [shape: f32[2,2,10,18,4], index: 0, kind: input, shape index: {}]   ;;  %s2318_s1 = inlined_call_operand.vmem [shape: f32[36,16], index: 1, kind: input, shape index: {}]   ;;  %s2319_s2 = inlined_call_operand.vmem [shape: f32[1,16], index: 2, kind: input, shape index: {}]   ;;  %s2320_s3 = inlined_call_operand.vmem [shape: f32[2,256,16], index: 3, kind: output, shape index: {}]  }
   0x1   :  { %s1759_s14 = smov 0   ;;  %s1761_s15 = smov 0  }
   0x2   :  { %s1763_s16 = smov 0  }
   0x3 LB: > { %s25_s17 = sadd.s32 1, %s1717_s14  ;;  %s28_s18 = sadd.s32 1, %s1721_s15  ;;  %s1725_s16 = sphi %s1763_s16, %s13_s16   ;;  %s1721_s15 = sphi %s1761_s15, %s2324_s15   ;;  %s1717_s14 = sphi %s1759_s14, %s2323_s14   ;;  %s1713_s13 = sphi %s1757_s13, %s2322_s13   ;;  %s1709_s12 = sphi %s1755_s12, %s2321_s12  }
   0x4   : > { %p26_p0 = scmp.ge.s32.totalorder %s25_s17, 2  ;;  %p1447_p1 = scmp.ge.s32.totalorder %s1725_s16, 1 }
   0x5   : > { %p183_p2 = scmp.lt.s32.totalorder %s1725_s16, 5 }
   0x6   : > { %s2326_s17 = smov (%p26_p0, %s25_s17), 0  ;;  %s2328_s18 = smov (!%p26_p0, %s28_s18), %s1721_s15 }
   0x7   : > { %p184_p3 = pnand %p1447_p1, %p183_p2  ;;  %p30_p4 = scmp.ge.s32.totalorder %s2328_s18, 2 }
   0x8   : > { %p225_p5 = scmp.lt.s32.totalorder (!%p184_p3), %s1713_s13, 1  ;;  %p227_p6 = scmp.lt.s32.totalorder (!%p184_p3), %s1709_s12, 1  ;;  %vm270_vm0 = vcmask (!%p184_p3), 31744   ;;  %v1081_v38 = vld [vmem:[%s2318_s1] sm:$0xff] (!%p184_p3)  ;;  %v1082_v39 = vld [vmem:[%s2318_s1 + $0x8] sm:$0xff] (!%p184_p3)  ;;  %v1083_v41 = vld [vmem:[%s2318_s1 + $0x10] sm:$0xff] (!%p184_p3) }
   0x9   : > { %s2330_s18 = smov (%p30_p4, %s2328_s18), 0  ;;  %187 = sbr.rel (%p184_p3) target bundleno = 617 (0x269), region = 32 }
   0xa   : > { %s1727_s27 = smov (!%p184_p3), 4   ;;  %s1728_s28 = smov (!%p184_p3), 8   ;;  %v1623_v40 = vpack.c.bf16 (!%p184_p3), %v1082_v39, %v1081_v38  ;;  %v1084_v42 = vld [vmem:[%s2318_s1 + $0x18] sm:$0xff] (!%p184_p3)  ;;  %v1085_v44 = vld [vmem:[%s2318_s1 + $0x20] sm:$0xf] (!%p184_p3)  ;;  %vm1142_vm1 = vcmask (!%p184_p3), 1043456  }
   0xb   : > { %s1729_s29 = smov (!%p184_p3), 12   ;;  %s1730_s30 = smov (!%p184_p3), 16   ;;  %v1627_v43 = vpack.c.bf16 (!%p184_p3), %v1084_v42, %v1083_v41  ;;  %vm367_vm2 = vcmask (!%p184_p3), 64544   ;;  %vm464_vm3 = vcmask (!%p184_p3), 97344   ;;  %vm562_vm4 = vcmask (!%p184_p3), 130144  }
   0xc   : > { %s1731_s4 = smov (!%p184_p3), 20   ;;  %s1732_s5 = smov (!%p184_p3), 24   ;;  %1624 = vmatprep.subr.bf16.mxu0 (!%p184_p3), %v1623_v40  ;;  %1631 = vmatprep.subr.bf16.mxu1 (!%p184_p3), %v1623_v40  ;;  %vm659_vm5 = vcmask (!%p184_p3), 162944   ;;  %vm756_vm6 = vcmask (!%p184_p3), 195744   ;;  %vm854_vm7 = vcmask (!%p184_p3), 228544   ;;  %vm951_vm8 = vcmask (!%p184_p3), 261344  }
   0xd   : > { %s1733_s6 = smov (!%p184_p3), 28   ;;  %s1734_s11 = smov (!%p184_p3), 32   ;;  %1626 = vmatpush3.bf16.msra.mxu0 (!%p184_p3), %v1623_v40  ;;  %1634 = vmatpush3.bf16.msra.mxu1 (!%p184_p3), %v1623_v40  ;;  %vm1048_vm9 = vcmask (!%p184_p3), 294144   ;;  %vm1093_vm10 = vcmask (!%p184_p3), 293888   ;;  %vm1291_vm11 = vcmask (!%p184_p3), 130048  }
   0xe   : > { %1628 = vmatprep.subr.bf16.mxu0 (!%p184_p3), %v1627_v43  ;;  %1632 = vmatprep.subr.bf16.mxu1 (!%p184_p3), %v1627_v43  ;;  %s1449_s25 = sshll.u32 (!%p184_p3), %s1709_s12, 4 }
   0xf   : > { %p244_p7 = scmp.lt.s32.totalorder (!%p184_p3), %s1449_s25, 31 }
  0x10   : > { %s2332_s13 = smov (!%p225_p5, %s1713_s13), 1 }
  0x11   : > { %s228_s19 = scalar_select %p227_p6, %s1709_s12, 1  ;;  %1630 = vmatpush3.bf16.msra.mxu0 %v1627_v43  ;;  %1635 = vmatpush3.bf16.msra.mxu1 %v1627_v43 }
  0x12   : > { %s1638_s20 = smul.u32 60, %s2332_s13  ;;  %1597 = vmatprep.subr.msk.mxu0 %vm1142_vm1, %v1085_v44  ;;  %1633 = vmatprep.subr.msk.mxu1 %vm1142_vm1, %v1085_v44  ;;  %s2334_s25 = smov (!%p244_p7, %s1449_s25), 31 }
  0x13   : > { %s1637_s21 = smul.u32 30, %s228_s19 }
  0x15   : > { %s231_s22 = sadd.s32 %s1638_s20, %s1637_s21  ;;  %1598 = vmatpush3.msk.msra.mxu0 %vm1142_vm1, %v1085_v44  ;;  %1636 = vmatpush3.msk.msra.mxu1 %vm1142_vm1, %v1085_v44 }
  0x16   : > { %s1448_s23 = sshll.u32 %s231_s22, 3 }
  0x17   : > { %s1795_s26 = scalar_lea.vmem %s2317_s0, %s1448_s23 }
  0x18   : > { %v288_v0 = vld [vmem:[%s1795_s26 + $0x9] sm:$0xff]  ;;  %v287_v1 = vld [vmem:[%s1795_s26 + $0x1] sm:$0xff]  ;;  %v1808_v4 = vld [vmem:[%s1795_s26 + $0x78] sm:$0xff] }
  0x19   : > { %321 = vrot.lane.b32.xlu1 %v288_v0, %s1727_s27  ;;  %319 = vrot.lane.b32.xlu0 %v287_v1, %s1727_s27  ;;  %v1802_v2 = vld [vmem:[%s1795_s26 + $0x69] sm:$0xff]  ;;  %v1805_v3 = vld [vmem:[%s1795_s26 + $0x61] sm:$0xff]  ;;  %281 = vst.msk [vmem:[#allocation2 + $0x50] sm:$0xff] %vm270_vm0, %v1808_v4 }
  0x1a   : > { %v1452_v5 = vld [vmem:[%s1795_s26 + $0x18] sm:$0xff]  ;;  %v1812_v6 = vld [vmem:[%s1795_s26 + $0x80] sm:$0xff]  ;;  %v1830_v10 = vld [vmem:[%s1795_s26 + $0x90] sm:$0xff] }
  0x1b   : > { %v1453_v7 = vld [vmem:[%s1795_s26 + $0x20] sm:$0xff]  ;;  %273 = vst.msk [vmem:[#allocation2 + $0x10] sm:$0xff] %vm270_vm0, %v1452_v5  ;;  %282 = vst.msk [vmem:[#allocation2 + $0x58] sm:$0xff] %vm270_vm0, %v1812_v6  ;;  %v1833_v11 = vld [vmem:[%s1795_s26 + $0x30] sm:$0xff] }
  0x1c   : > { %274 = vst.msk [vmem:[#allocation2 + $0x18] sm:$0xff] %vm270_vm0, %v1453_v7  ;;  %v1826_v8 = vld [vmem:[%s1795_s26 + $0x62] sm:$0xff]  ;;  %v1836_v12 = vld [vmem:[%s1795_s26 + $0x98] sm:$0xff]  ;;  %283 = vst.msk [vmem:[#allocation2 + $0x60] sm:$0xff] %vm270_vm0, %v1830_v10 }
  0x1d   : > { %337 = vrot.lane.b32.xlu1 %v1802_v2, %s1727_s27  ;;  %335 = vrot.lane.b32.xlu0 %v1805_v3, %s1727_s27  ;;  %v384_v9 = vld [vmem:[%s1795_s26 + $0x2] sm:$0xff]  ;;  %v1839_v13 = vld [vmem:[%s1795_s26 + $0x38] sm:$0xff]  ;;  %275 = vst.msk [vmem:[#allocation2 + $0x20] sm:$0xff] %vm270_vm0, %v1833_v11  ;;  %284 = vst.msk [vmem:[#allocation2 + $0x68] sm:$0xff] %vm270_vm0, %v1836_v12 }
  0x1e   : > { %276 = vst.msk [vmem:[#allocation2 + $0x28] sm:$0xff] %vm270_vm0, %v1839_v13  ;;  %v1853_v14 = vld [vmem:[%s1795_s26 + $0x6a] sm:$0xff]  ;;  %v254_v17 = vld [vmem:[%s1795_s26] sm:$0xff]  ;;  %v1540_v36 = vld [vmem:[%s1795_s26 + $0x92] sm:$0xff] }
  0x1f   : > { %v385_v15 = vld [vmem:[%s1795_s26 + $0xa] sm:$0xff]  ;;  %271 = vst.msk [vmem:[#allocation2] sm:$0xff] %vm270_vm0, %v254_v17  ;;  %v1873_v21 = vld [vmem:[%s1795_s26 + $0x60] sm:$0xff]  ;;  %v1532_v37 = vld [vmem:[%s1795_s26 + $0x32] sm:$0xff] }
  0x20   : > { %v255_v16 = vld [vmem:[%s1795_s26 + $0x8] sm:$0xff]  ;;  %279 = vst.msk [vmem:[#allocation2 + $0x40] sm:$0xff] %vm270_vm0, %v1873_v21  ;;  %v1884_v22 = vld [vmem:[%s1795_s26 + $0xb0] sm:$0xff]  ;;  %v1900_v24 = vld [vmem:[%s1795_s26 + $0x79] sm:$0xff] }
  0x21   : > { %432 = vrot.lane.b32.xlu1 %v1826_v8, %s1728_s28  ;;  %416 = vrot.lane.b32.xlu0 %v384_v9, %s1728_s28  ;;  %272 = vst.msk [vmem:[#allocation2 + $0x8] sm:$0xff] %vm270_vm0, %v255_v16  ;;  %v1860_v18 = vld [vmem:[%s1795_s26 + $0xa8] sm:$0xff]  ;;  %v1887_v23 = vld [vmem:[%s1795_s26 + $0x50] sm:$0xff]  ;;  %286 = vst.msk [vmem:[#allocation2 + $0x78] sm:$0xff] %vm270_vm0, %v1884_v22 }
  0x22   : > { %v1863_v19 = vld [vmem:[%s1795_s26 + $0x48] sm:$0xff]  ;;  %285 = vst.msk [vmem:[#allocation2 + $0x70] sm:$0xff] %vm270_vm0, %v1860_v18  ;;  %278 = vst.msk [vmem:[#allocation2 + $0x38] sm:$0xff] %vm270_vm0, %v1887_v23  ;;  %v1468_v25 = vld [vmem:[%s1795_s26 + $0x19] sm:$0xff] }
  0x23   : > { %v1870_v20 = vld [vmem:[%s1795_s26 + $0x68] sm:$0xff]  ;;  %277 = vst.msk [vmem:[#allocation2 + $0x30] sm:$0xff] %vm270_vm0, %v1863_v19  ;;  %v1917_v28 = vld [vmem:[%s1795_s26 + $0x7a] sm:$0xff]  ;;  %v1524_v32 = vld [vmem:[%s1795_s26 + $0x91] sm:$0xff] }
  0x24   : > { %280 = vst.msk [vmem:[#allocation2 + $0x48] sm:$0xff] %vm270_vm0, %v1870_v20  ;;  %v1910_v26 = vld [vmem:[%s1795_s26 + $0x81] sm:$0xff]  ;;  %v1516_v33 = vld [vmem:[%s1795_s26 + $0x31] sm:$0xff]  ;;  %v1525_v34 = vld [vmem:[%s1795_s26 + $0x99] sm:$0xff] }
  0x25   : > { %434 = vrot.lane.b32.xlu1 %v1853_v14, %s1728_s28  ;;  %418 = vrot.lane.b32.xlu0 %v385_v15, %s1728_s28  ;;  %v1469_v27 = vld [vmem:[%s1795_s26 + $0x21] sm:$0xff]  ;;  %v1517_v35 = vld [vmem:[%s1795_s26 + $0x39] sm:$0xff] }
  0x26   : > { %v1484_v29 = vld [vmem:[%s1795_s26 + $0x1a] sm:$0xff]  ;;  %v1930_v30 = vld [vmem:[%s1795_s26 + $0x82] sm:$0xff]  ;;  %v1527_v63 = vld [vmem:[%s1795_s26 + $0xb1] sm:$0xff] }
  0x27   : > { %v1485_v31 = vld [vmem:[%s1795_s26 + $0x22] sm:$0xff]  ;;  %v1541_v45 = vld [vmem:[%s1795_s26 + $0x9a] sm:$0xff]  ;;  %v1519_v0 = vld [vmem:[%s1795_s26 + $0x51] sm:$0xff] }
  0x28   : > { %v1533_v46 = vld [vmem:[%s1795_s26 + $0x3a] sm:$0xff]  ;;  %v1526_v55 = vld [vmem:[%s1795_s26 + $0xa9] sm:$0xff] }
  0x29   : > { %530 = vrot.lane.b32.xlu1 %v1808_v4, %s1729_s29  ;;  %514 = vrot.lane.b32.xlu0 %v1452_v5, %s1729_s29  ;;  %v1518_v56 = vld [vmem:[%s1795_s26 + $0x49] sm:$0xff] }
  0x2a   : > { %v1534_v9 = vld [vmem:[%s1795_s26 + $0x4a] sm:$0xff] }
  0x2b   : > { %v1513_v42 = vld [vmem:[%s1795_s26 + $0xc8] sm:$0xff] }
  0x2d   : > { %532 = vrot.lane.b32.xlu1 %v1812_v6, %s1729_s29  ;;  %516 = vrot.lane.b32.xlu0 %v1453_v7, %s1729_s29  ;;  %v1542_v7 = vld [vmem:[%s1795_s26 + $0xaa] sm:$0xff] }
  0x31   : > { %627 = vrot.lane.b32.xlu1 %v1900_v24, %s1730_s30  ;;  %611 = vrot.lane.b32.xlu0 %v1468_v25, %s1730_s30 }
  0x35   : > { %339 = vrot.lane.b32.xlu1 %v1900_v24, %s1727_s27  ;;  %323 = vrot.lane.b32.xlu0 %v1468_v25, %s1727_s27 }
  0x39   : > { %629 = vrot.lane.b32.xlu1 %v1910_v26, %s1730_s30  ;;  %613 = vrot.lane.b32.xlu0 %v1469_v27, %s1730_s30 }
  0x3d   : > { %724 = vrot.lane.b32.xlu1 %v1917_v28, %s1731_s4  ;;  %708 = vrot.lane.b32.xlu0 %v1484_v29, %s1731_s4 }
  0x41   : > { %341 = vrot.lane.b32.xlu1 %v1910_v26, %s1727_s27  ;;  %325 = vrot.lane.b32.xlu0 %v1469_v27, %s1727_s27 }
  0x45   : > { %436 = vrot.lane.b32.xlu1 %v1917_v28, %s1728_s28  ;;  %420 = vrot.lane.b32.xlu0 %v1484_v29, %s1728_s28 }
  0x49   : > { %726 = vrot.lane.b32.xlu1 %v1930_v30, %s1731_s4  ;;  %710 = vrot.lane.b32.xlu0 %v1485_v31, %s1731_s4 }
  0x4d   : > { %822 = vrot.lane.b32.xlu1 %v1830_v10, %s1732_s5  ;;  %806 = vrot.lane.b32.xlu0 %v1833_v11, %s1732_s5 }
  0x51   : > { %438 = vrot.lane.b32.xlu1 %v1930_v30, %s1728_s28  ;;  %422 = vrot.lane.b32.xlu0 %v1485_v31, %s1728_s28 }
  0x55   : > { %534 = vrot.lane.b32.xlu1 %v1830_v10, %s1729_s29  ;;  %518 = vrot.lane.b32.xlu0 %v1833_v11, %s1729_s29 }
  0x59   : > { %824 = vrot.lane.b32.xlu1 %v1836_v12, %s1732_s5  ;;  %808 = vrot.lane.b32.xlu0 %v1839_v13, %s1732_s5 }
  0x5d   : > { %919 = vrot.lane.b32.xlu1 %v1524_v32, %s1733_s6  ;;  %903 = vrot.lane.b32.xlu0 %v1516_v33, %s1733_s6 }
  0x61   : > { %536 = vrot.lane.b32.xlu1 %v1836_v12, %s1729_s29  ;;  %520 = vrot.lane.b32.xlu0 %v1839_v13, %s1729_s29 }
  0x65   : > { %631 = vrot.lane.b32.xlu1 %v1524_v32, %s1730_s30  ;;  %615 = vrot.lane.b32.xlu0 %v1516_v33, %s1730_s30 }
  0x69   : > { %921 = vrot.lane.b32.xlu1 %v1525_v34, %s1733_s6  ;;  %905 = vrot.lane.b32.xlu0 %v1517_v35, %s1733_s6 }
  0x6d   : > { %1016 = vrot.lane.b32.xlu1 %v1540_v36, %s1734_s11  ;;  %1000 = vrot.lane.b32.xlu0 %v1532_v37, %s1734_s11 }
  0x71   : > { %343 = vrot.lane.b32.xlu1 %v1524_v32, %s1727_s27  ;;  %327 = vrot.lane.b32.xlu0 %v1516_v33, %s1727_s27 }
  0x75   : > { %633 = vrot.lane.b32.xlu1 %v1525_v34, %s1730_s30  ;;  %617 = vrot.lane.b32.xlu0 %v1517_v35, %s1730_s30 }
  0x79   : > { %728 = vrot.lane.b32.xlu1 %v1540_v36, %s1731_s4  ;;  %712 = vrot.lane.b32.xlu0 %v1532_v37, %s1731_s4 }
  0x7d   : > { %1018 = vrot.lane.b32.xlu1 %v1541_v45, %s1734_s11  ;;  %1002 = vrot.lane.b32.xlu0 %v1533_v46, %s1734_s11 }
  0x81   : > { %345 = vrot.lane.b32.xlu1 %v1525_v34, %s1727_s27  ;;  %329 = vrot.lane.b32.xlu0 %v1517_v35, %s1727_s27  ;;  %v1512_v35 = vld [vmem:[%s1795_s26 + $0xc0] sm:$0xff] }
  0x85   : > { %440 = vrot.lane.b32.xlu1 %v1540_v36, %s1728_s28  ;;  %424 = vrot.lane.b32.xlu0 %v1532_v37, %s1728_s28 }
  0x89   : > { %730 = vrot.lane.b32.xlu1 %v1541_v45, %s1731_s4  ;;  %714 = vrot.lane.b32.xlu0 %v1533_v46, %s1731_s4 }
  0x8b   : > { %v322_v47 = vpop.permute.xlu1 %321  ;;  %v320_v48 = vpop.permute.xlu0 %319 }
  0x8c   : > { %369 = vst.msk [vmem:[#allocation2 + $0x8] sm:$0xff] %vm367_vm2, %v322_v47  ;;  %368 = vst.msk [vmem:[#allocation2] sm:$0xff] %vm367_vm2, %v320_v48 }
  0x8d   : > { %826 = vrot.lane.b32.xlu1 %v1860_v18, %s1732_s5  ;;  %810 = vrot.lane.b32.xlu0 %v1863_v19, %s1732_s5 }
  0x8f   : > { %v338_v49 = vpop.permute.xlu1 %337  ;;  %v336_v50 = vpop.permute.xlu0 %335 }
  0x90   : > { %377 = vst.msk [vmem:[#allocation2 + $0x48] sm:$0xff] %vm367_vm2, %v338_v49  ;;  %376 = vst.msk [vmem:[#allocation2 + $0x40] sm:$0xff] %vm367_vm2, %v336_v50 }
  0x91   : > { %442 = vrot.lane.b32.xlu1 %v1541_v45, %s1728_s28  ;;  %426 = vrot.lane.b32.xlu0 %v1533_v46, %s1728_s28  ;;  %v1528_v45 = vld [vmem:[%s1795_s26 + $0xc1] sm:$0xff] }
  0x93   : > { %v433_v51 = vpop.permute.xlu1 %432  ;;  %v417_v52 = vpop.permute.xlu0 %416 }
  0x94   : > { %473 = vst.msk [vmem:[#allocation2 + $0x40] sm:$0xff] %vm464_vm3, %v433_v51  ;;  %465 = vst.msk [vmem:[#allocation2] sm:$0xff] %vm464_vm3, %v417_v52  ;;  %v1529_v51 = vld [vmem:[%s1795_s26 + $0xc9] sm:$0xff] }
  0x95   : > { %538 = vrot.lane.b32.xlu1 %v1860_v18, %s1729_s29  ;;  %522 = vrot.lane.b32.xlu0 %v1863_v19, %s1729_s29  ;;  %v1543_v19 = vld [vmem:[%s1795_s26 + $0xb2] sm:$0xff] }
  0x97   : > { %v435_v53 = vpop.permute.xlu1 %434  ;;  %v419_v54 = vpop.permute.xlu0 %418 }
  0x98   : > { %474 = vst.msk [vmem:[#allocation2 + $0x48] sm:$0xff] %vm464_vm3, %v435_v53  ;;  %466 = vst.msk [vmem:[#allocation2 + $0x8] sm:$0xff] %vm464_vm3, %v419_v54 }
  0x99   : > { %828 = vrot.lane.b32.xlu1 %v1884_v22, %s1732_s5  ;;  %812 = vrot.lane.b32.xlu0 %v1887_v23, %s1732_s5 }
  0x9b   : > { %v531_v57 = vpop.permute.xlu1 %530  ;;  %v515_v58 = vpop.permute.xlu0 %514 }
  0x9c   : > { %571 = vst.msk [vmem:[#allocation2 + $0x40] sm:$0xff] %vm562_vm4, %v531_v57  ;;  %563 = vst.msk [vmem:[#allocation2] sm:$0xff] %vm562_vm4, %v515_v58 }
  0x9d   : > { %923 = vrot.lane.b32.xlu1 %v1526_v55, %s1733_s6  ;;  %907 = vrot.lane.b32.xlu0 %v1518_v56, %s1733_s6 }
  0x9f   : > { %v533_v59 = vpop.permute.xlu1 %532  ;;  %v517_v60 = vpop.permute.xlu0 %516 }
  0xa0   : > { %572 = vst.msk [vmem:[#allocation2 + $0x48] sm:$0xff] %vm562_vm4, %v533_v59  ;;  %564 = vst.msk [vmem:[#allocation2 + $0x8] sm:$0xff] %vm562_vm4, %v517_v60 }
  0xa1   : > { %540 = vrot.lane.b32.xlu1 %v1884_v22, %s1729_s29  ;;  %524 = vrot.lane.b32.xlu0 %v1887_v23, %s1729_s29  ;;  %v1535_v22 = vld [vmem:[%s1795_s26 + $0x52] sm:$0xff] }
  0xa3   : > { %v628_v61 = vpop.permute.xlu1 %627  ;;  %v612_v62 = vpop.permute.xlu0 %611 }
  0xa4   : > { %668 = vst.msk [vmem:[#allocation2 + $0x40] sm:$0xff] %vm659_vm5, %v628_v61  ;;  %660 = vst.msk [vmem:[#allocation2] sm:$0xff] %vm659_vm5, %v612_v62  ;;  %v1545_v61 = vld [vmem:[%s1795_s26 + $0xca] sm:$0xff] }
  0xa5   : > { %635 = vrot.lane.b32.xlu1 %v1526_v55, %s1730_s30  ;;  %619 = vrot.lane.b32.xlu0 %v1518_v56, %s1730_s30 }
  0xa7   : > { %v340_v1 = vpop.permute.xlu1 %339  ;;  %v324_v5 = vpop.permute.xlu0 %323 }
  0xa8   : > { %378 = vst.msk [vmem:[#allocation2 + $0x50] sm:$0xff] %vm367_vm2, %v340_v1  ;;  %370 = vst.msk [vmem:[#allocation2 + $0x10] sm:$0xff] %vm367_vm2, %v324_v5  ;;  %v1514_v5 = vld [vmem:[%s1795_s26 + $0xd8] sm:$0xff] }
  0xa9   : > { %925 = vrot.lane.b32.xlu1 %v1527_v63, %s1733_s6  ;;  %909 = vrot.lane.b32.xlu0 %v1519_v0, %s1733_s6 }
  0xab   : > { %v630_v10 = vpop.permute.xlu1 %629  ;;  %v614_v11 = vpop.permute.xlu0 %613 }
  0xac   : > { %669 = vst.msk [vmem:[#allocation2 + $0x48] sm:$0xff] %vm659_vm5, %v630_v10  ;;  %661 = vst.msk [vmem:[#allocation2 + $0x8] sm:$0xff] %vm659_vm5, %v614_v11  ;;  %v1515_v10 = vld [vmem:[%s1795_s26 + $0xe0] sm:$0xff] }
  0xad   : > { %1020 = vrot.lane.b32.xlu1 %v1542_v7, %s1734_s11  ;;  %1004 = vrot.lane.b32.xlu0 %v1534_v9, %s1734_s11 }
  0xaf   : > { %v725_v12 = vpop.permute.xlu1 %724  ;;  %v709_v13 = vpop.permute.xlu0 %708 }
  0xb0   : > { %765 = vst.msk [vmem:[#allocation2 + $0x40] sm:$0xff] %vm756_vm6, %v725_v12  ;;  %757 = vst.msk [vmem:[#allocation2] sm:$0xff] %vm756_vm6, %v709_v13 }
  0xb1   : > { %347 = vrot.lane.b32.xlu1 %v1526_v55, %s1727_s27  ;;  %331 = vrot.lane.b32.xlu0 %v1518_v56, %s1727_s27 }
  0xb3   : > { %v342_v15 = vpop.permute.xlu1 %341  ;;  %v326_v16 = vpop.permute.xlu0 %325 }
  0xb4   : > { %379 = vst.msk [vmem:[#allocation2 + $0x58] sm:$0xff] %vm367_vm2, %v342_v15  ;;  %371 = vst.msk [vmem:[#allocation2 + $0x18] sm:$0xff] %vm367_vm2, %v326_v16 }
  0xb5   : > { %637 = vrot.lane.b32.xlu1 %v1527_v63, %s1730_s30  ;;  %621 = vrot.lane.b32.xlu0 %v1519_v0, %s1730_s30 }
  0xb7   : > { %v437_v17 = vpop.permute.xlu1 %436  ;;  %v421_v18 = vpop.permute.xlu0 %420 }
  0xb8   : > { %475 = vst.msk [vmem:[#allocation2 + $0x50] sm:$0xff] %vm464_vm3, %v437_v17  ;;  %467 = vst.msk [vmem:[#allocation2 + $0x10] sm:$0xff] %vm464_vm3, %v421_v18 }
  0xb9   : > { %732 = vrot.lane.b32.xlu1 %v1542_v7, %s1731_s4  ;;  %716 = vrot.lane.b32.xlu0 %v1534_v9, %s1731_s4 }
  0xbb   : > { %v727_v23 = vpop.permute.xlu1 %726  ;;  %v711_v25 = vpop.permute.xlu0 %710 }
  0xbc   : > { %766 = vst.msk [vmem:[#allocation2 + $0x48] sm:$0xff] %vm756_vm6, %v727_v23  ;;  %758 = vst.msk [vmem:[#allocation2 + $0x8] sm:$0xff] %vm756_vm6, %v711_v25 }
  0xbd   : > { %1022 = vrot.lane.b32.xlu1 %v1543_v19, %s1734_s11  ;;  %1006 = vrot.lane.b32.xlu0 %v1535_v22, %s1734_s11 }
  0xbf   : > { %v823_v27 = vpop.permute.xlu1 %822  ;;  %v807_v29 = vpop.permute.xlu0 %806 }
  0xc0   : > { %863 = vst.msk [vmem:[#allocation2 + $0x40] sm:$0xff] %vm854_vm7, %v823_v27  ;;  %855 = vst.msk [vmem:[#allocation2] sm:$0xff] %vm854_vm7, %v807_v29 }
  0xc1   : > { %349 = vrot.lane.b32.xlu1 %v1527_v63, %s1727_s27  ;;  %333 = vrot.lane.b32.xlu0 %v1519_v0, %s1727_s27 }
  0xc3   : > { %v439_v31 = vpop.permute.xlu1 %438  ;;  %v423_v32 = vpop.permute.xlu0 %422 }
  0xc4   : > { %476 = vst.msk [vmem:[#allocation2 + $0x58] sm:$0xff] %vm464_vm3, %v439_v31  ;;  %468 = vst.msk [vmem:[#allocation2 + $0x18] sm:$0xff] %vm464_vm3, %v423_v32 }
  0xc5   : > { %444 = vrot.lane.b32.xlu1 %v1542_v7, %s1728_s28  ;;  %428 = vrot.lane.b32.xlu0 %v1534_v9, %s1728_s28 }
  0xc7   : > { %v535_v33 = vpop.permute.xlu1 %534  ;;  %v519_v34 = vpop.permute.xlu0 %518 }
  0xc8   : > { %573 = vst.msk [vmem:[#allocation2 + $0x50] sm:$0xff] %vm562_vm4, %v535_v33  ;;  %565 = vst.msk [vmem:[#allocation2 + $0x10] sm:$0xff] %vm562_vm4, %v519_v34 }
  0xc9   : > { %734 = vrot.lane.b32.xlu1 %v1543_v19, %s1731_s4  ;;  %718 = vrot.lane.b32.xlu0 %v1535_v22, %s1731_s4 }
  0xcb   : > { %v825_v36 = vpop.permute.xlu1 %824  ;;  %v809_v37 = vpop.permute.xlu0 %808 }
  0xcc   : > { %864 = vst.msk [vmem:[#allocation2 + $0x48] sm:$0xff] %vm854_vm7, %v825_v36  ;;  %856 = vst.msk [vmem:[#allocation2 + $0x8] sm:$0xff] %vm854_vm7, %v809_v37 }
  0xcd   : > { %830 = vrot.lane.b32.xlu1 %v1512_v35, %s1732_s5  ;;  %814 = vrot.lane.b32.xlu0 %v1873_v21, %s1732_s5 }
  0xcf   : > { %v920_v38 = vpop.permute.xlu1 %919  ;;  %v904_v39 = vpop.permute.xlu0 %903 }
  0xd0   : > { %960 = vst.msk [vmem:[#allocation2 + $0x40] sm:$0xff] %vm951_vm8, %v920_v38  ;;  %952 = vst.msk [vmem:[#allocation2] sm:$0xff] %vm951_vm8, %v904_v39 }
  0xd1   : > { %446 = vrot.lane.b32.xlu1 %v1543_v19, %s1728_s28  ;;  %430 = vrot.lane.b32.xlu0 %v1535_v22, %s1728_s28 }
  0xd3   : > { %v537_v40 = vpop.permute.xlu1 %536  ;;  %v521_v41 = vpop.permute.xlu0 %520 }
  0xd4   : > { %574 = vst.msk [vmem:[#allocation2 + $0x58] sm:$0xff] %vm562_vm4, %v537_v40  ;;  %566 = vst.msk [vmem:[#allocation2 + $0x18] sm:$0xff] %vm562_vm4, %v521_v41 }
  0xd5   : > { %542 = vrot.lane.b32.xlu1 %v1512_v35, %s1729_s29  ;;  %526 = vrot.lane.b32.xlu0 %v1873_v21, %s1729_s29 }
  0xd7   : > { %v632_v43 = vpop.permute.xlu1 %631  ;;  %v616_v44 = vpop.permute.xlu0 %615 }
  0xd8   : > { %670 = vst.msk [vmem:[#allocation2 + $0x50] sm:$0xff] %vm659_vm5, %v632_v43  ;;  %662 = vst.msk [vmem:[#allocation2 + $0x10] sm:$0xff] %vm659_vm5, %v616_v44 }
  0xd9   : > { %832 = vrot.lane.b32.xlu1 %v1513_v42, %s1732_s5  ;;  %816 = vrot.lane.b32.xlu0 %v1870_v20, %s1732_s5 }
  0xdb   : > { %v922_v46 = vpop.permute.xlu1 %921  ;;  %v906_v47 = vpop.permute.xlu0 %905 }
  0xdc   : > { %961 = vst.msk [vmem:[#allocation2 + $0x48] sm:$0xff] %vm951_vm8, %v922_v46  ;;  %953 = vst.msk [vmem:[#allocation2 + $0x8] sm:$0xff] %vm951_vm8, %v906_v47 }
  0xdd   : > { %927 = vrot.lane.b32.xlu1 %v1528_v45, %s1733_s6  ;;  %911 = vrot.lane.b32.xlu0 %v1805_v3, %s1733_s6 }
  0xdf   : > { %v1017_v21 = vpop.permute.xlu1 %1016  ;;  %v1001_v48 = vpop.permute.xlu0 %1000 }
  0xe0   : > { %1057 = vst.msk [vmem:[#allocation2 + $0x40] sm:$0xff] %vm1048_vm9, %v1017_v21  ;;  %1049 = vst.msk [vmem:[#allocation2] sm:$0xff] %vm1048_vm9, %v1001_v48 }
  0xe1   : > { %544 = vrot.lane.b32.xlu1 %v1513_v42, %s1729_s29  ;;  %528 = vrot.lane.b32.xlu0 %v1870_v20, %s1729_s29 }
  0xe3   : > { %v344_v49 = vpop.permute.xlu1 %343  ;;  %v328_v50 = vpop.permute.xlu0 %327 }
  0xe4   : > { %380 = vst.msk [vmem:[#allocation2 + $0x60] sm:$0xff] %vm367_vm2, %v344_v49  ;;  %372 = vst.msk [vmem:[#allocation2 + $0x20] sm:$0xff] %vm367_vm2, %v328_v50 }
  0xe5   : > { %639 = vrot.lane.b32.xlu1 %v1528_v45, %s1730_s30  ;;  %623 = vrot.lane.b32.xlu0 %v1805_v3, %s1730_s30  ;;  %v1544_v3 = vld [vmem:[%s1795_s26 + $0xc2] sm:$0xff] }
  0xe7   : > { %v634_v52 = vpop.permute.xlu1 %633  ;;  %v618_v53 = vpop.permute.xlu0 %617  ;;  %v1065_v54 = vld [vmem:[#allocation2] sm:$0xff] }
  0xe8   : > { %v1073_v55 = vld [vmem:[#allocation2 + $0x40] sm:$0xff]  ;;  %671 = vst.msk [vmem:[#allocation2 + $0x58] sm:$0xff] %vm659_vm5, %v634_v52  ;;  %663 = vst.msk [vmem:[#allocation2 + $0x18] sm:$0xff] %vm659_vm5, %v618_v53  ;;  %1599 = vmatprep.mubr.msk.f32.mxu0 %vm1093_vm10, %v1065_v54 }
  0xe9   : > { %1611 = vmatprep.mubr.msk.f32.mxu1 %vm1093_vm10, %v1073_v55  ;;  %929 = vrot.lane.b32.xlu1 %v1529_v51, %s1733_s6 }
  0xea   : > { %913 = vrot.lane.b32.xlu0 %v1802_v2, %s1733_s6 }
  0xeb   : > { %v729_v20 = vpop.permute.xlu1 %728  ;;  %v713_v56 = vpop.permute.xlu0 %712 }
  0xec   : > { %767 = vst.msk [vmem:[#allocation2 + $0x50] sm:$0xff] %vm756_vm6, %v729_v20  ;;  %759 = vst.msk [vmem:[#allocation2 + $0x10] sm:$0xff] %vm756_vm6, %v713_v56 }
  0xed   : > { %1024 = vrot.lane.b32.xlu1 %v1544_v3, %s1734_s11 }
  0xee   : > { %1008 = vrot.lane.b32.xlu0 %v1826_v8, %s1734_s11 }
  0xef   : > { %v1019_v57 = vpop.permute.xlu1 %1018  ;;  %v1003_v58 = vpop.permute.xlu0 %1002 }
  0xf0   : > { %1058 = vst.msk [vmem:[#allocation2 + $0x48] sm:$0xff] %vm1048_vm9, %v1019_v57  ;;  %1050 = vst.msk [vmem:[#allocation2 + $0x8] sm:$0xff] %vm1048_vm9, %v1003_v58 }
  0xf1   : > { %641 = vrot.lane.b32.xlu1 %v1529_v51, %s1730_s30 }
  0xf2   : > { %625 = vrot.lane.b32.xlu0 %v1802_v2, %s1730_s30 }
  0xf3   : > { %v346_v59 = vpop.permute.xlu1 %345  ;;  %v330_v60 = vpop.permute.xlu0 %329 }
  0xf4   : > { %381 = vst.msk [vmem:[#allocation2 + $0x68] sm:$0xff] %vm367_vm2, %v346_v59  ;;  %373 = vst.msk [vmem:[#allocation2 + $0x28] sm:$0xff] %vm367_vm2, %v330_v60 }
  0xf5   : > { %736 = vrot.lane.b32.xlu1 %v1544_v3, %s1731_s4 }
  0xf6   : > { %720 = vrot.lane.b32.xlu0 %v1826_v8, %s1731_s4 }
  0xf7   : > { %v441_v62 = vpop.permute.xlu1 %440  ;;  %v425_v63 = vpop.permute.xlu0 %424  ;;  %v1066_v0 = vld [vmem:[#allocation2 + $0x8] sm:$0xff] }
  0xf8   : > { %v1074_v1 = vld [vmem:[#allocation2 + $0x48] sm:$0xff]  ;;  %477 = vst.msk [vmem:[#allocation2 + $0x60] sm:$0xff] %vm464_vm3, %v441_v62  ;;  %469 = vst.msk [vmem:[#allocation2 + $0x20] sm:$0xff] %vm464_vm3, %v425_v63  ;;  %1600 = vmatmul.mubr.msk.f32.vlgmr.msra.gmra.mrb[0].mxu0 %vm1093_vm10, %v1066_v0 }
  0xf9   : > { %1612 = vmatmul.mubr.msk.f32.vlgmr.msra.gmra.mrb[0].mxu1 %vm1093_vm10, %v1074_v1  ;;  %1026 = vrot.lane.b32.xlu1 %v1545_v61, %s1734_s11 }
  0xfa   : > { %1010 = vrot.lane.b32.xlu0 %v1853_v14, %s1734_s11 }
  0xfb   : > { %v731_v2 = vpop.permute.xlu1 %730  ;;  %v715_v8 = vpop.permute.xlu0 %714 }
  0xfc   : > { %768 = vst.msk [vmem:[#allocation2 + $0x58] sm:$0xff] %vm756_vm6, %v731_v2  ;;  %760 = vst.msk [vmem:[#allocation2 + $0x18] sm:$0xff] %vm756_vm6, %v715_v8 }
  0xfd   : > { %738 = vrot.lane.b32.xlu1 %v1545_v61, %s1731_s4 }
  0xfe   : > { %722 = vrot.lane.b32.xlu0 %v1853_v14, %s1731_s4  ;;  %v1530_v14 = vld [vmem:[%s1795_s26 + $0xd9] sm:$0xff] }
  0xff   : > { %v827_v7 = vpop.permute.xlu1 %826  ;;  %v811_v9 = vpop.permute.xlu0 %810 }
 0x100   : > { %865 = vst.msk [vmem:[#allocation2 + $0x50] sm:$0xff] %vm854_vm7, %v827_v7  ;;  %857 = vst.msk [vmem:[#allocation2 + $0x10] sm:$0xff] %vm854_vm7, %v811_v9 }
 0x101   : > { %834 = vrot.lane.b32.xlu1 %v1514_v5, %s1732_s5 }
 0x102   : > { %818 = vrot.lane.b32.xlu0 %v1808_v4, %s1732_s5  ;;  %v1531_v4 = vld [vmem:[%s1795_s26 + $0xe1] sm:$0xff] }
 0x103   : > { %v443_v11 = vpop.permute.xlu1 %442  ;;  %v427_v12 = vpop.permute.xlu0 %426 }
 0x104   : > { %478 = vst.msk [vmem:[#allocation2 + $0x68] sm:$0xff] %vm464_vm3, %v443_v11  ;;  %470 = vst.msk [vmem:[#allocation2 + $0x28] sm:$0xff] %vm464_vm3, %v427_v12 }
 0x105   : > { %836 = vrot.lane.b32.xlu1 %v1515_v10, %s1732_s5 }
 0x106   : > { %820 = vrot.lane.b32.xlu0 %v1812_v6, %s1732_s5  ;;  %v1546_v6 = vld [vmem:[%s1795_s26 + $0xda] sm:$0xff] }
 0x107   : > { %v539_v13 = vpop.permute.xlu1 %538  ;;  %v523_v15 = vpop.permute.xlu0 %522 }
 0x108   : > { %575 = vst.msk [vmem:[#allocation2 + $0x60] sm:$0xff] %vm562_vm4, %v539_v13  ;;  %567 = vst.msk [vmem:[#allocation2 + $0x20] sm:$0xff] %vm562_vm4, %v523_v15 }
 0x109   : > { %931 = vrot.lane.b32.xlu1 %v1530_v14, %s1733_s6 }
 0x10a   : > { %915 = vrot.lane.b32.xlu0 %v1900_v24, %s1733_s6  ;;  %v1547_v24 = vld [vmem:[%s1795_s26 + $0xe2] sm:$0xff]  ;;  %s1450_s26 = sshll.u32 %s2332_s13, 5 }
 0x10b   : > { %v829_v16 = vpop.permute.xlu1 %828  ;;  %v813_v17 = vpop.permute.xlu0 %812  ;;  %s250_s27 = sadd.s32 %s1450_s26, %s2334_s25 }
 0x10c   : > { %866 = vst.msk [vmem:[#allocation2 + $0x58] sm:$0xff] %vm854_vm7, %v829_v16  ;;  %858 = vst.msk [vmem:[#allocation2 + $0x18] sm:$0xff] %vm854_vm7, %v813_v17  ;;  %s1451_s28 = sshll.u32 %s250_s27, 3 }
 0x10d   : > { %933 = vrot.lane.b32.xlu1 %v1531_v4, %s1733_s6 }
 0x10e   : > { %917 = vrot.lane.b32.xlu0 %v1910_v26, %s1733_s6  ;;  %s2268_s6 = scalar_lea.vmem %s2320_s3, %s1451_s28 }
 0x10f   : > { %v924_v18 = vpop.permute.xlu1 %923  ;;  %v908_v19 = vpop.permute.xlu0 %907 }
 0x110   : > { %962 = vst.msk [vmem:[#allocation2 + $0x50] sm:$0xff] %vm951_vm8, %v924_v18  ;;  %954 = vst.msk [vmem:[#allocation2 + $0x10] sm:$0xff] %vm951_vm8, %v908_v19 }
 0x111   : > { %1028 = vrot.lane.b32.xlu1 %v1546_v6, %s1734_s11 }
 0x112   : > { %1012 = vrot.lane.b32.xlu0 %v1917_v28, %s1734_s11 }
 0x113   : > { %v541_v22 = vpop.permute.xlu1 %540  ;;  %v525_v23 = vpop.permute.xlu0 %524 }
 0x114   : > { %576 = vst.msk [vmem:[#allocation2 + $0x68] sm:$0xff] %vm562_vm4, %v541_v22  ;;  %568 = vst.msk [vmem:[#allocation2 + $0x28] sm:$0xff] %vm562_vm4, %v525_v23 }
 0x115   : > { %1030 = vrot.lane.b32.xlu1 %v1547_v24, %s1734_s11 }
 0x116   : > { %1014 = vrot.lane.b32.xlu0 %v1930_v30, %s1734_s11 }
 0x117   : > { %v636_v26 = vpop.permute.xlu1 %635  ;;  %v620_v25 = vpop.permute.xlu0 %619 }
 0x118   : > { %672 = vst.msk [vmem:[#allocation2 + $0x60] sm:$0xff] %vm659_vm5, %v636_v26  ;;  %664 = vst.msk [vmem:[#allocation2 + $0x20] sm:$0xff] %vm659_vm5, %v620_v25 }
 0x11b   : > { %v926_v27 = vpop.permute.xlu1 %925  ;;  %v910_v28 = vpop.permute.xlu0 %909 }
 0x11c   : > { %963 = vst.msk [vmem:[#allocation2 + $0x58] sm:$0xff] %vm951_vm8, %v926_v27  ;;  %955 = vst.msk [vmem:[#allocation2 + $0x18] sm:$0xff] %vm951_vm8, %v910_v28 }
 0x11f   : > { %v1021_v29 = vpop.permute.xlu1 %1020  ;;  %v1005_v31 = vpop.permute.xlu0 %1004 }
 0x120   : > { %1059 = vst.msk [vmem:[#allocation2 + $0x50] sm:$0xff] %vm1048_vm9, %v1021_v29  ;;  %1051 = vst.msk [vmem:[#allocation2 + $0x10] sm:$0xff] %vm1048_vm9, %v1005_v31 }
 0x123   : > { %v348_v32 = vpop.permute.xlu1 %347  ;;  %v332_v30 = vpop.permute.xlu0 %331 }
 0x124   : > { %382 = vst.msk [vmem:[#allocation2 + $0x70] sm:$0xff] %vm367_vm2, %v348_v32  ;;  %374 = vst.msk [vmem:[#allocation2 + $0x30] sm:$0xff] %vm367_vm2, %v332_v30  ;;  %v1548_v32 = vld [vmem:[%s2319_s2] ss:$0 sm:$0xff] }
 0x127   : > { %v638_v33 = vpop.permute.xlu1 %637  ;;  %v622_v34 = vpop.permute.xlu0 %621  ;;  %v1067_v35 = vld [vmem:[#allocation2 + $0x10] sm:$0xff] }
 0x128   : > { %v1075_v36 = vld [vmem:[#allocation2 + $0x50] sm:$0xff]  ;;  %673 = vst.msk [vmem:[#allocation2 + $0x68] sm:$0xff] %vm659_vm5, %v638_v33  ;;  %665 = vst.msk [vmem:[#allocation2 + $0x28] sm:$0xff] %vm659_vm5, %v622_v34  ;;  %1602 = vmatprep.mubr.msk.f32.mxu0 %vm1093_vm10, %v1067_v35 }
 0x129   : > { %1614 = vmatprep.mubr.msk.f32.mxu1 %vm1093_vm10, %v1075_v36 }
 0x12b   : > { %v733_v37 = vpop.permute.xlu1 %732  ;;  %v717_v38 = vpop.permute.xlu0 %716 }
 0x12c   : > { %769 = vst.msk [vmem:[#allocation2 + $0x60] sm:$0xff] %vm756_vm6, %v733_v37  ;;  %761 = vst.msk [vmem:[#allocation2 + $0x20] sm:$0xff] %vm756_vm6, %v717_v38 }
 0x12f   : > { %v1023_v39 = vpop.permute.xlu1 %1022  ;;  %v1007_v40 = vpop.permute.xlu0 %1006 }
 0x130   : > { %1060 = vst.msk [vmem:[#allocation2 + $0x58] sm:$0xff] %vm1048_vm9, %v1023_v39  ;;  %1052 = vst.msk [vmem:[#allocation2 + $0x18] sm:$0xff] %vm1048_vm9, %v1007_v40 }
 0x133   : > { %v350_v41 = vpop.permute.xlu1 %349  ;;  %v334_v42 = vpop.permute.xlu0 %333 }
 0x134   : > { %383 = vst.msk [vmem:[#allocation2 + $0x78] sm:$0xff] %vm367_vm2, %v350_v41  ;;  %375 = vst.msk [vmem:[#allocation2 + $0x38] sm:$0xff] %vm367_vm2, %v334_v42 }
 0x137   : > { %v445_v43 = vpop.permute.xlu1 %444  ;;  %v429_v44 = vpop.permute.xlu0 %428  ;;  %v1068_v45 = vld [vmem:[#allocation2 + $0x18] sm:$0xff] }
 0x138   : > { %v1076_v46 = vld [vmem:[#allocation2 + $0x58] sm:$0xff]  ;;  %479 = vst.msk [vmem:[#allocation2 + $0x70] sm:$0xff] %vm464_vm3, %v445_v43  ;;  %471 = vst.msk [vmem:[#allocation2 + $0x30] sm:$0xff] %vm464_vm3, %v429_v44  ;;  %1603 = vmatmul.mubr.msk.f32.gmra.mrb[2].mxu0 %vm1093_vm10, %v1068_v45 }
 0x139   : > { %1615 = vmatmul.mubr.msk.f32.gmra.mrb[2].mxu1 %vm1093_vm10, %v1076_v46 }
 0x13b   : > { %v735_v47 = vpop.permute.xlu1 %734  ;;  %v719_v21 = vpop.permute.xlu0 %718 }
 0x13c   : > { %770 = vst.msk [vmem:[#allocation2 + $0x68] sm:$0xff] %vm756_vm6, %v735_v47  ;;  %762 = vst.msk [vmem:[#allocation2 + $0x28] sm:$0xff] %vm756_vm6, %v719_v21 }
 0x13f   : > { %v831_v48 = vpop.permute.xlu1 %830  ;;  %v815_v49 = vpop.permute.xlu0 %814 }
 0x140   : > { %867 = vst.msk [vmem:[#allocation2 + $0x60] sm:$0xff] %vm854_vm7, %v831_v48  ;;  %859 = vst.msk [vmem:[#allocation2 + $0x20] sm:$0xff] %vm854_vm7, %v815_v49 }
 0x143   : > { %v447_v50 = vpop.permute.xlu1 %446  ;;  %v431_v51 = vpop.permute.xlu0 %430 }
 0x144   : > { %480 = vst.msk [vmem:[#allocation2 + $0x78] sm:$0xff] %vm464_vm3, %v447_v50  ;;  %472 = vst.msk [vmem:[#allocation2 + $0x38] sm:$0xff] %vm464_vm3, %v431_v51 }
 0x147   : > { %v543_v52 = vpop.permute.xlu1 %542  ;;  %v527_v53 = vpop.permute.xlu0 %526 }
 0x148   : > { %577 = vst.msk [vmem:[#allocation2 + $0x70] sm:$0xff] %vm562_vm4, %v543_v52  ;;  %569 = vst.msk [vmem:[#allocation2 + $0x30] sm:$0xff] %vm562_vm4, %v527_v53 }
 0x14b   : > { %v833_v54 = vpop.permute.xlu1 %832  ;;  %v817_v55 = vpop.permute.xlu0 %816 }
 0x14c   : > { %868 = vst.msk [vmem:[#allocation2 + $0x68] sm:$0xff] %vm854_vm7, %v833_v54  ;;  %860 = vst.msk [vmem:[#allocation2 + $0x28] sm:$0xff] %vm854_vm7, %v817_v55 }
 0x14f   : > { %v928_v3 = vpop.permute.xlu1 %927  ;;  %v912_v20 = vpop.permute.xlu0 %911 }
 0x150   : > { %964 = vst.msk [vmem:[#allocation2 + $0x60] sm:$0xff] %vm951_vm8, %v928_v3  ;;  %956 = vst.msk [vmem:[#allocation2 + $0x20] sm:$0xff] %vm951_vm8, %v912_v20 }
 0x153   : > { %v545_v56 = vpop.permute.xlu1 %544  ;;  %v529_v57 = vpop.permute.xlu0 %528 }
 0x154   : > { %578 = vst.msk [vmem:[#allocation2 + $0x78] sm:$0xff] %vm562_vm4, %v545_v56  ;;  %570 = vst.msk [vmem:[#allocation2 + $0x38] sm:$0xff] %vm562_vm4, %v529_v57 }
 0x157   : > { %v640_v58 = vpop.permute.xlu1 %639  ;;  %v624_v59 = vpop.permute.xlu0 %623 }
 0x158   : > { %674 = vst.msk [vmem:[#allocation2 + $0x70] sm:$0xff] %vm659_vm5, %v640_v58  ;;  %666 = vst.msk [vmem:[#allocation2 + $0x30] sm:$0xff] %vm659_vm5, %v624_v59 }
 0x15b   : > { %v930_v60 = vpop.permute.xlu1 %929 }
 0x15c   : > { %v914_v61 = vpop.permute.xlu0 %913  ;;  %965 = vst.msk [vmem:[#allocation2 + $0x68] sm:$0xff] %vm951_vm8, %v930_v60 }
 0x15d   : > { %957 = vst.msk [vmem:[#allocation2 + $0x28] sm:$0xff] %vm951_vm8, %v914_v61 }
 0x15f   : > { %v1025_v62 = vpop.permute.xlu1 %1024 }
 0x160   : > { %v1009_v63 = vpop.permute.xlu0 %1008  ;;  %1061 = vst.msk [vmem:[#allocation2 + $0x60] sm:$0xff] %vm1048_vm9, %v1025_v62 }
 0x161   : > { %1053 = vst.msk [vmem:[#allocation2 + $0x20] sm:$0xff] %vm1048_vm9, %v1009_v63 }
 0x163   : > { %v642_v0 = vpop.permute.xlu1 %641 }
 0x164   : > { %v626_v1 = vpop.permute.xlu0 %625  ;;  %675 = vst.msk [vmem:[#allocation2 + $0x78] sm:$0xff] %vm659_vm5, %v642_v0 }
 0x165   : > { %667 = vst.msk [vmem:[#allocation2 + $0x38] sm:$0xff] %vm659_vm5, %v626_v1 }
 0x167   : > { %v737_v2 = vpop.permute.xlu1 %736  ;;  %v1077_v7 = vld [vmem:[#allocation2 + $0x60] sm:$0xff] }
 0x168   : > { %v721_v8 = vpop.permute.xlu0 %720  ;;  %v1069_v5 = vld [vmem:[#allocation2 + $0x20] sm:$0xff]  ;;  %771 = vst.msk [vmem:[#allocation2 + $0x70] sm:$0xff] %vm756_vm6, %v737_v2  ;;  %1617 = vmatprep.mubr.msk.f32.mxu1 %vm1093_vm10, %v1077_v7 }
 0x169   : > { %763 = vst.msk [vmem:[#allocation2 + $0x30] sm:$0xff] %vm756_vm6, %v721_v8  ;;  %1605 = vmatprep.mubr.msk.f32.mxu0 %vm1093_vm10, %v1069_v5 }
 0x16b   : > { %v1027_v9 = vpop.permute.xlu1 %1026 }
 0x16c   : > { %v1011_v10 = vpop.permute.xlu0 %1010  ;;  %1062 = vst.msk [vmem:[#allocation2 + $0x68] sm:$0xff] %vm1048_vm9, %v1027_v9 }
 0x16d   : > { %1054 = vst.msk [vmem:[#allocation2 + $0x28] sm:$0xff] %vm1048_vm9, %v1011_v10 }
 0x16f   : > { %v739_v11 = vpop.permute.xlu1 %738 }
 0x170   : > { %v723_v12 = vpop.permute.xlu0 %722  ;;  %772 = vst.msk [vmem:[#allocation2 + $0x78] sm:$0xff] %vm756_vm6, %v739_v11 }
 0x171   : > { %764 = vst.msk [vmem:[#allocation2 + $0x38] sm:$0xff] %vm756_vm6, %v723_v12 }
 0x173   : > { %v835_v14 = vpop.permute.xlu1 %834  ;;  %v1078_v4 = vld [vmem:[#allocation2 + $0x68] sm:$0xff] }
 0x174   : > { %v819_v13 = vpop.permute.xlu0 %818  ;;  %v1070_v15 = vld [vmem:[#allocation2 + $0x28] sm:$0xff]  ;;  %869 = vst.msk [vmem:[#allocation2 + $0x70] sm:$0xff] %vm854_vm7, %v835_v14  ;;  %1618 = vmatmul.mubr.msk.f32.gmra.mrb[4].mxu1 %vm1093_vm10, %v1078_v4 }
 0x175   : > { %861 = vst.msk [vmem:[#allocation2 + $0x30] sm:$0xff] %vm854_vm7, %v819_v13  ;;  %1606 = vmatmul.mubr.msk.f32.gmra.mrb[4].mxu0 %vm1093_vm10, %v1070_v15 }
 0x177   : > { %v837_v16 = vpop.permute.xlu1 %836 }
 0x178   : > { %v821_v17 = vpop.permute.xlu0 %820  ;;  %870 = vst.msk [vmem:[#allocation2 + $0x78] sm:$0xff] %vm854_vm7, %v837_v16 }
 0x179   : > { %862 = vst.msk [vmem:[#allocation2 + $0x38] sm:$0xff] %vm854_vm7, %v821_v17 }
 0x17b   : > { %v932_v6 = vpop.permute.xlu1 %931 }
 0x17c   : > { %v916_v18 = vpop.permute.xlu0 %915  ;;  %966 = vst.msk [vmem:[#allocation2 + $0x70] sm:$0xff] %vm951_vm8, %v932_v6 }
 0x17d   : > { %958 = vst.msk [vmem:[#allocation2 + $0x30] sm:$0xff] %vm951_vm8, %v916_v18 }
 0x17f   : > { %v934_v19 = vpop.permute.xlu1 %933 }
 0x180   : > { %v918_v24 = vpop.permute.xlu0 %917  ;;  %967 = vst.msk [vmem:[#allocation2 + $0x78] sm:$0xff] %vm951_vm8, %v934_v19 }
 0x181   : > { %959 = vst.msk [vmem:[#allocation2 + $0x38] sm:$0xff] %vm951_vm8, %v918_v24 }
 0x183   : > { %v1029_v22 = vpop.permute.xlu1 %1028 }
 0x184   : > { %v1013_v23 = vpop.permute.xlu0 %1012  ;;  %1063 = vst.msk [vmem:[#allocation2 + $0x70] sm:$0xff] %vm1048_vm9, %v1029_v22 }
 0x185   : > { %1055 = vst.msk [vmem:[#allocation2 + $0x30] sm:$0xff] %vm1048_vm9, %v1013_v23 }
 0x187   : > { %v1031_v26 = vpop.permute.xlu1 %1030 }
 0x188   : > { %v1015_v25 = vpop.permute.xlu0 %1014  ;;  %1064 = vst.msk [vmem:[#allocation2 + $0x78] sm:$0xff] %vm1048_vm9, %v1031_v26 }
 0x189   : > { %1056 = vst.msk [vmem:[#allocation2 + $0x38] sm:$0xff] %vm1048_vm9, %v1015_v25 }
 0x18b   : > { %v1079_v28 = vld [vmem:[#allocation2 + $0x70] sm:$0xff] }
 0x18c   : > { %v1071_v27 = vld [vmem:[#allocation2 + $0x30] sm:$0xff]  ;;  %1620 = vmatprep.mubr.msk.f32.mxu1 %vm1093_vm10, %v1079_v28 }
 0x18d   : > { %1608 = vmatprep.mubr.msk.f32.mxu0 %vm1093_vm10, %v1071_v27 }
 0x18f   : > { %v1080_v31 = vld [vmem:[#allocation2 + $0x78] sm:$0xff] }
 0x190   : > { %v1072_v29 = vld [vmem:[#allocation2 + $0x38] sm:$0xff]  ;;  %1621 = vmatmul.mubr.msk.f32.gmra.mrb[6].mxu1 %vm1093_vm10, %v1080_v31 }
 0x191   : > { %1609 = vmatmul.mubr.msk.f32.gmra.mrb[6].mxu0 %vm1093_vm10, %v1072_v29 }
 0x1cb   : > { %v1601_v30 = vpop.f32.mrb[0].mxu0 }
 0x1cc   : > { %v1613_v33 = vpop.f32.mrb[0].mxu1  ;;  %v1218_v34 = vadd.f32 %v1601_v30, %v1548_v32  ;;  %v1212_v36 = vpop.f32.mrb[1].mxu0 }
 0x1cd   : > { %v1258_v35 = vadd.f32 %v1613_v33, %v1548_v32  ;;  %v1252_v37 = vpop.f32.mrb[1].mxu1  ;;  %v1213_v38 = vadd.f32 %v1548_v32, %v1212_v36 }
 0x1ce   : > { %v1253_v39 = vadd.f32 %v1548_v32, %v1252_v37  ;;  %1293 = vst.msk [vmem:[%s2268_s6 + $0x8] sm:$0xff] %vm1291_vm11, %v1218_v34 }
 0x1cf   : > { %1301 = vst.msk [vmem:[%s2268_s6 + $0x48] sm:$0xff] %vm1291_vm11, %v1258_v35  ;;  %1292 = vst.msk [vmem:[%s2268_s6] sm:$0xff] %vm1291_vm11, %v1213_v38 }
 0x1d0   : > { %1300 = vst.msk [vmem:[%s2268_s6 + $0x40] sm:$0xff] %vm1291_vm11, %v1253_v39 }
 0x20b   : > { %v1604_v40 = vpop.f32.mrb[2].mxu0 }
 0x20c   : > { %v1616_v41 = vpop.f32.mrb[2].mxu1  ;;  %v1228_v42 = vadd.f32 %v1604_v40, %v1548_v32  ;;  %v1222_v44 = vpop.f32.mrb[3].mxu0 }
 0x20d   : > { %v1268_v43 = vadd.f32 %v1616_v41, %v1548_v32  ;;  %v1262_v45 = vpop.f32.mrb[3].mxu1  ;;  %v1223_v46 = vadd.f32 %v1548_v32, %v1222_v44 }
 0x20e   : > { %v1263_v47 = vadd.f32 %v1548_v32, %v1262_v45  ;;  %1295 = vst.msk [vmem:[%s2268_s6 + $0x18] sm:$0xff] %vm1291_vm11, %v1228_v42 }
 0x20f   : > { %1303 = vst.msk [vmem:[%s2268_s6 + $0x58] sm:$0xff] %vm1291_vm11, %v1268_v43  ;;  %1294 = vst.msk [vmem:[%s2268_s6 + $0x10] sm:$0xff] %vm1291_vm11, %v1223_v46 }
 0x210   : > { %1302 = vst.msk [vmem:[%s2268_s6 + $0x50] sm:$0xff] %vm1291_vm11, %v1263_v47 }
 0x247   : > { %v1619_v48 = vpop.f32.mrb[4].mxu1 }
 0x248   : > { %v1607_v21 = vpop.f32.mrb[4].mxu0  ;;  %v1278_v50 = vadd.f32 %v1619_v48, %v1548_v32  ;;  %v1272_v52 = vpop.f32.mrb[5].mxu1 }
 0x249   : > { %v1238_v49 = vadd.f32 %v1607_v21, %v1548_v32  ;;  %v1232_v51 = vpop.f32.mrb[5].mxu0  ;;  %v1273_v54 = vadd.f32 %v1548_v32, %v1272_v52 }
 0x24a   : > { %v1233_v53 = vadd.f32 %v1548_v32, %v1232_v51  ;;  %1305 = vst.msk [vmem:[%s2268_s6 + $0x68] sm:$0xff] %vm1291_vm11, %v1278_v50 }
 0x24b   : > { %1297 = vst.msk [vmem:[%s2268_s6 + $0x28] sm:$0xff] %vm1291_vm11, %v1238_v49  ;;  %1304 = vst.msk [vmem:[%s2268_s6 + $0x60] sm:$0xff] %vm1291_vm11, %v1273_v54 }
 0x24c   : > { %1296 = vst.msk [vmem:[%s2268_s6 + $0x20] sm:$0xff] %vm1291_vm11, %v1233_v53 }
 0x263   : > { %v1622_v3 = vpop.f32.mrb[6].mxu1 }
 0x264   : > { %v1610_v55 = vpop.f32.mrb[6].mxu0  ;;  %v1288_v56 = vadd.f32 %v1622_v3, %v1548_v32  ;;  %v1282_v58 = vpop.f32.mrb[7].mxu1 }
 0x265   : > { %v1248_v20 = vadd.f32 %v1610_v55, %v1548_v32  ;;  %v1242_v57 = vpop.f32.mrb[7].mxu0  ;;  %v1283_v60 = vadd.f32 %v1548_v32, %v1282_v58 }
 0x266   : > { %v1243_v59 = vadd.f32 %v1548_v32, %v1242_v57  ;;  %1307 = vst.msk [vmem:[%s2268_s6 + $0x78] sm:$0xff] %vm1291_vm11, %v1288_v56 }
 0x267   : > { %1299 = vst.msk [vmem:[%s2268_s6 + $0x38] sm:$0xff] %vm1291_vm11, %v1248_v20  ;;  %1306 = vst.msk [vmem:[%s2268_s6 + $0x70] sm:$0xff] %vm1291_vm11, %v1283_v60 }
 0x268   : > { %1298 = vst.msk [vmem:[%s2268_s6 + $0x30] sm:$0xff] %vm1291_vm11, %v1243_v59 }
 0x269 PF: > { %s13_s16 = sadd.s32 1, %s1725_s16   ;;  %s2321_s12 = smov %s1717_s14 }
 0x26a   : > { %p10_p8 = scmp.ge.s32.totalorder %s13_s16, 6   ;;  %s2322_s13 = smov %s1721_s15 }
 0x26b   : > { %s2323_s14 = smov %s2326_s17  ;;  %s2324_s15 = smov %s2330_s18 }
 0x26c   :  { %12 = sbr.rel (!%p10_p8) target bundleno = 3 (0x3), region = 70 }

</bundles_post_ra>
